<compile_context>
chip_gen: v5e
topology: v5e:2x2
jax: 0.10.0
libtpu: 0.0.40
codegen_flags: <defaults>
</compile_context>

<pallas_src>
import functools

import jax
import jax.numpy as jnp
from jax.experimental import pallas as pl
from jax.experimental.pallas import tpu as pltpu


def _round_up(x, m):
    return (x + m - 1) // m * m


def _fire_conv_kernel(x_ref, w_ref, b_ref, o_ref, *, tH, Wout_p, KH, KWCin):
    """Grid = (batch, Hout_p // tH).

    x_ref : (1, Hp, Wout_p, KW*Cin)  bf16 KW-folded padded image (resident
                                     across all h steps of one batch element)
    w_ref : (KH, KW*Cin, Cout_p)     bf16 folded weights
    b_ref : (1, Cout_p)              f32 bias
    o_ref : (1, tH, Wout_p, Cout_p)  output tile (8-aligned sublanes,
                                     lane-dense 128-multiple channels)
    """
    row0 = pl.multiple_of(pl.program_id(1) * tH, tH)

    def tap(kh):
        # Slice along the leading H axis (not a tiled dim) -> free address
        # math; the (tH, Wout_p) -> (tH*Wout_p) merge is 8-aligned -> no
        # relayout copy.
        return x_ref[0, pl.ds(row0 + kh, tH), :, :].reshape(tH * Wout_p, KWCin)

    # KH accumulating MXU matmuls with f32 accumulation.
    acc = jnp.dot(tap(0), w_ref[0], preferred_element_type=jnp.float32)
    for kh in range(1, KH):
        acc += jnp.dot(tap(kh), w_ref[kh], preferred_element_type=jnp.float32)

    acc = jnp.maximum(acc + b_ref[...], 0.0)          # bias + ReLU, once, f32
    o_ref[...] = acc.reshape(1, tH, Wout_p, acc.shape[-1]).astype(o_ref.dtype)


def _pick_tile_h(Hout, Wout_p, Cout_p, KWCin, KH, out_itemsize, vmem_budget):
    """Biggest h-tile (multiple of 8, whole map if possible) fitting VMEM."""
    lane_kwcin = _round_up(KWCin, 128)   # lane padding of the folded image
    sub_kwcin = _round_up(KWCin, 8)      # sublane padding of the weight block

    def footprint(tH):
        Hout_p = _round_up(Hout, tH)
        Hp = Hout_p + KH - 1
        img = Hp * Wout_p * lane_kwcin * 2 * 2           # bf16, double-buffered
        wgt = KH * sub_kwcin * Cout_p * 2 * 2
        outb = tH * Wout_p * Cout_p * out_itemsize * 2   # double-buffered
        accb = tH * Wout_p * Cout_p * 4                  # f32 accumulator
        return img + wgt + outb + accb

    tH = _round_up(Hout, 8)              # whole feature map per step if it fits
    while tH > 8 and footprint(tH) > vmem_budget:
        tH = _round_up(max(8, tH // 2), 8)
    # TODO(synk): for conv1-like shapes (H ~ 224, tiny Cin) where even the
    # resident folded image exceeds the v7x 64 MiB budget, fall back to an
    # h-tiled input block with a KH-1 halo instead of whole-image residency.
    return tH


def fire_conv(x_nchw, weight, bias, padding, *, compute_dtype=jnp.bfloat16):
    """FireConv forward: Conv2d(stride=1, padding) + ReLU, PyTorch NCHW layout.

    x_nchw : (N, Cin, H, W) float32
    weight : (Cout, Cin, KH, KW)
    bias   : (Cout,)
    """
    if isinstance(padding, int):
        ph, pw = padding, padding
    else:
        ph, pw = padding

    N, Cin, H, W = x_nchw.shape
    Cout, Cin_w, KH, KW = weight.shape
    assert Cin == Cin_w

    Hout = H + 2 * ph - KH + 1
    Wout = W + 2 * pw - KW + 1
    Wout_p = _round_up(Wout, 8)            # 8-aligned output sublanes
    Cout_p = _round_up(Cout, 128)          # lane-dense output channels
    KWCin = KW * Cin
    out_dtype = x_nchw.dtype
    out_itemsize = x_nchw.dtype.itemsize

    # Generation-aware VMEM budget (64 MiB physical on v7x, 128 MiB v5e/v6e).
    try:
        vmem_cap = int(pltpu.get_tpu_info().vmem_capacity_bytes)
    except Exception:
        vmem_cap = 64 * 1024 * 1024
    vmem_limit = max(32 * 1024 * 1024, min(vmem_cap * 3 // 4, 96 * 1024 * 1024))

    tH = _pick_tile_h(Hout, Wout_p, Cout_p, KWCin, KH, out_itemsize, vmem_limit)
    Hout_p = _round_up(Hout, tH)
    grid = (N, Hout_p // tH)

    # ---- Boundary glue (plain XLA) -----------------------------------------
    # NCHW -> NHWC, halo pad (extra zero rows/cols cover the Hout/Wout round-up),
    # KW fold along the channel (lane) axis, and a SINGLE cast to bf16.
    x_nhwc = jnp.transpose(x_nchw, (0, 2, 3, 1))
    x_pad = jnp.pad(
        x_nhwc,
        ((0, 0), (ph, ph + (Hout_p - Hout)), (pw, pw + (Wout_p - Wout)), (0, 0)))
    x_fold = jnp.concatenate(
        [x_pad[:, :, kw:kw + Wout_p, :] for kw in range(KW)], axis=-1)
    x_fold = x_fold.astype(compute_dtype)          # (N, Hp, Wout_p, KW*Cin)
    Hp = x_fold.shape[1]                           # = Hout_p + KH - 1

    # Weights: (Cout, Cin, KH, KW) -> (KH, KW, Cin, Cout) -> (KH, KW*Cin, Cout_p)
    # The (kw, c) flatten order matches the x_fold lane order kw*Cin + c.
    w = jnp.transpose(weight, (2, 3, 1, 0)).reshape(KH, KWCin, Cout)
    w = jnp.pad(w, ((0, 0), (0, 0), (0, Cout_p - Cout))).astype(compute_dtype)
    b = jnp.pad(bias, (0, Cout_p - Cout)).astype(jnp.float32).reshape(1, Cout_p)

    kernel = functools.partial(
        _fire_conv_kernel, tH=tH, Wout_p=Wout_p, KH=KH, KWCin=KWCin)

    in_bytes = x_fold.size * x_fold.dtype.itemsize
    w_bytes = w.size * w.dtype.itemsize
    out_bytes = N * Hout_p * Wout_p * Cout_p * out_itemsize
    cost = pl.CostEstimate(
        flops=2 * N * Hout * Wout * KH * KW * Cin * Cout,
        transcendentals=0,
        bytes_accessed=in_bytes + w_bytes + b.size * 4 + out_bytes)

    out_padded = pl.pallas_call(
        kernel,
        out_shape=jax.ShapeDtypeStruct((N, Hout_p, Wout_p, Cout_p), out_dtype),
        grid_spec=pltpu.PrefetchScalarGridSpec(
            num_scalar_prefetch=0,
            grid=grid,
            in_specs=[
                # Whole folded image for one batch element; block index is
                # independent of h so it stays resident across all h steps.
                pl.BlockSpec((1, Hp, Wout_p, KWCin),
                             lambda bi, hi: (bi, 0, 0, 0)),
                pl.BlockSpec((KH, KWCin, Cout_p), lambda bi, hi: (0, 0, 0)),
                pl.BlockSpec((1, Cout_p), lambda bi, hi: (0, 0)),
            ],
            out_specs=pl.BlockSpec((1, tH, Wout_p, Cout_p),
                                   lambda bi, hi: (bi, hi, 0, 0)),
        ),
        compiler_params=pltpu.CompilerParams(
            # Batch axis parallel (v7x 2-TC split keeps per-core image
            # residency); h sequential so the image is DMA'd once per batch.
            dimension_semantics=("parallel", "arbitrary"),
            vmem_limit_bytes=vmem_limit),
        cost_estimate=cost,
    )(x_fold, w, b)

    # Drop spatial / channel padding, back to PyTorch NCHW.
    # TODO(synk): when chaining fire layers, keep NHWC + padded-Cout between
    # layers (and fuse expand1x1/expand3x3 heads) to skip these HBM passes.
    return jnp.transpose(out_padded[:, :Hout, :Wout, :Cout], (0, 3, 1, 2))


def _reference(x_nchw, weight, bias, padding):
    """Pure-JAX reference (lax conv), NCHW in/out."""
    if isinstance(padding, int):
        ph, pw = padding, padding
    else:
        ph, pw = padding
    y = jax.lax.conv_general_dilated(
        x_nchw, weight,
        window_strides=(1, 1),
        padding=((ph, ph), (pw, pw)),
        dimension_numbers=("NCHW", "OIHW", "NCHW"),
        precision=jax.lax.Precision.HIGHEST)
    y = y + bias.reshape(1, -1, 1, 1)
    return jnp.maximum(y, 0.0)


if __name__ == "__main__":
    # FireConv as used in the SqueezeNet expand path: kernel_size=3, padding=1.
    N, Cin, Hs, Ws = 2, 4, 16, 16
    Cout, KH, KW = 8, 3, 3
    padding = 1

    key = jax.random.PRNGKey(0)
    k_x, k_w, k_b = jax.random.split(key, 3)
    x = jax.random.normal(k_x, (N, Cin, Hs, Ws), dtype=jnp.float32)
    weight = 0.1 * jax.random.normal(k_w, (Cout, Cin, KH, KW), dtype=jnp.float32)
    bias = 0.1 * jax.random.normal(k_b, (Cout,), dtype=jnp.float32)

    out = jax.block_until_ready(fire_conv(x, weight, bias, padding))

    # Kernel multiplies bf16-rounded operands (exact products, f32 accumulate),
    # so compare against a reference built from the same bf16-rounded inputs.
    x_r = x.astype(jnp.bfloat16).astype(jnp.float32)
    w_r = weight.astype(jnp.bfloat16).astype(jnp.float32)
    ref = jax.block_until_ready(_reference(x_r, w_r, bias, padding))

    assert out.shape == ref.shape, (out.shape, ref.shape)
    max_err = float(jnp.max(jnp.abs(out - ref)))
    assert jnp.allclose(out, ref, atol=1e-3, rtol=1e-3), max_err

    print("KERNEL_OK")
</pallas_src>

<mosaic_0001>
module attributes {stable_mosaic.version = 11 : i64} {
  func.func @_fire_conv_kernel(%arg0: i32, %arg1: i32, %arg2: memref<1x18x16x12xbf16, #tpu.memory_space<vmem>>, %arg3: memref<3x12x128xbf16, #tpu.memory_space<vmem>>, %arg4: memref<1x128xf32, #tpu.memory_space<vmem>>, %arg5: memref<1x16x16x128xf32, #tpu.memory_space<vmem>>) attributes {dimension_semantics = [#tpu.dimension_semantics<parallel>, #tpu.dimension_semantics<arbitrary>], iteration_bounds = array<i64: 2, 1>, scalar_prefetch = 0 : i64, scratch_operands = 0 : i64, tpu.core_type = #tpu.core_type<tc>, window_params = [{transform_indices = @transform_0, window_bounds = array<i64: 1, 18, 16, 12>}, {pipeline_mode = #tpu.pipeline_mode<synchronous>, transform_indices = @transform_1, window_bounds = array<i64: 3, 12, 128>}, {pipeline_mode = #tpu.pipeline_mode<synchronous>, transform_indices = @transform_2, window_bounds = array<i64: 1, 128>}, {transform_indices = @transform_3, window_bounds = array<i64: 1, 16, 16, 128>}]} {
    %c16_i32 = arith.constant 16 : i32
    %0 = arith.muli %arg1, %c16_i32 : i32
    %1 = tpu.assume_multiple %0, 16 : i32
    %c0_i32 = arith.constant 0 : i32
    %2 = arith.addi %1, %c0_i32 : i32
    %c0 = arith.constant 0 : index
    %3 = arith.index_cast %2 : i32 to index
    %c0_0 = arith.constant 0 : index
    %c0_1 = arith.constant 0 : index
    %4 = vector.load %arg2[%c0, %3, %c0_0, %c0_1] : memref<1x18x16x12xbf16, #tpu.memory_space<vmem>>, vector<1x16x16x12xbf16>
    %5 = vector.shape_cast %4 : vector<1x16x16x12xbf16> to vector<16x16x12xbf16>
    %6 = vector.shape_cast %5 : vector<16x16x12xbf16> to vector<256x12xbf16>
    %c0_2 = arith.constant 0 : index
    %c0_3 = arith.constant 0 : index
    %c0_4 = arith.constant 0 : index
    %7 = vector.load %arg3[%c0_2, %c0_3, %c0_4] : memref<3x12x128xbf16, #tpu.memory_space<vmem>>, vector<1x12x128xbf16>
    %8 = vector.shape_cast %7 : vector<1x12x128xbf16> to vector<12x128xbf16>
    %cst = arith.constant dense<0.000000e+00> : vector<256x128xf32>
    %9 = tpu.matmul %6, %8, %cst {dimension_numbers = #tpu.dot_dimension_numbers<[1], [0], [0], [1], [0, 0, 1, 1], [], []>} : vector<256x12xbf16>, vector<12x128xbf16>, vector<256x128xf32> -> vector<256x128xf32>
    %c1_i32 = arith.constant 1 : i32
    %10 = arith.addi %1, %c1_i32 : i32
    %c0_5 = arith.constant 0 : index
    %11 = arith.index_cast %10 : i32 to index
    %c0_6 = arith.constant 0 : index
    %c0_7 = arith.constant 0 : index
    %12 = vector.load %arg2[%c0_5, %11, %c0_6, %c0_7] : memref<1x18x16x12xbf16, #tpu.memory_space<vmem>>, vector<1x16x16x12xbf16>
    %13 = vector.shape_cast %12 : vector<1x16x16x12xbf16> to vector<16x16x12xbf16>
    %14 = vector.shape_cast %13 : vector<16x16x12xbf16> to vector<256x12xbf16>
    %c1 = arith.constant 1 : index
    %c0_8 = arith.constant 0 : index
    %c0_9 = arith.constant 0 : index
    %15 = vector.load %arg3[%c1, %c0_8, %c0_9] : memref<3x12x128xbf16, #tpu.memory_space<vmem>>, vector<1x12x128xbf16>
    %16 = vector.shape_cast %15 : vector<1x12x128xbf16> to vector<12x128xbf16>
    %cst_10 = arith.constant dense<0.000000e+00> : vector<256x128xf32>
    %17 = tpu.matmul %14, %16, %cst_10 {dimension_numbers = #tpu.dot_dimension_numbers<[1], [0], [0], [1], [0, 0, 1, 1], [], []>} : vector<256x12xbf16>, vector<12x128xbf16>, vector<256x128xf32> -> vector<256x128xf32>
    %18 = arith.addf %9, %17 : vector<256x128xf32>
    %c2_i32 = arith.constant 2 : i32
    %19 = arith.addi %1, %c2_i32 : i32
    %c0_11 = arith.constant 0 : index
    %20 = arith.index_cast %19 : i32 to index
    %c0_12 = arith.constant 0 : index
    %c0_13 = arith.constant 0 : index
    %21 = vector.load %arg2[%c0_11, %20, %c0_12, %c0_13] : memref<1x18x16x12xbf16, #tpu.memory_space<vmem>>, vector<1x16x16x12xbf16>
    %22 = vector.shape_cast %21 : vector<1x16x16x12xbf16> to vector<16x16x12xbf16>
    %23 = vector.shape_cast %22 : vector<16x16x12xbf16> to vector<256x12xbf16>
    %c2 = arith.constant 2 : index
    %c0_14 = arith.constant 0 : index
    %c0_15 = arith.constant 0 : index
    %24 = vector.load %arg3[%c2, %c0_14, %c0_15] : memref<3x12x128xbf16, #tpu.memory_space<vmem>>, vector<1x12x128xbf16>
    %25 = vector.shape_cast %24 : vector<1x12x128xbf16> to vector<12x128xbf16>
    %cst_16 = arith.constant dense<0.000000e+00> : vector<256x128xf32>
    %26 = tpu.matmul %23, %25, %cst_16 {dimension_numbers = #tpu.dot_dimension_numbers<[1], [0], [0], [1], [0, 0, 1, 1], [], []>} : vector<256x12xbf16>, vector<12x128xbf16>, vector<256x128xf32> -> vector<256x128xf32>
    %27 = arith.addf %18, %26 : vector<256x128xf32>
    %c0_17 = arith.constant 0 : index
    %c0_18 = arith.constant 0 : index
    %28 = vector.load %arg4[%c0_17, %c0_18] : memref<1x128xf32, #tpu.memory_space<vmem>>, vector<1x128xf32>
    %29 = vector.broadcast %28 : vector<1x128xf32> to vector<256x128xf32>
    %30 = arith.addf %27, %29 : vector<256x128xf32>
    %cst_19 = arith.constant 0.000000e+00 : f32
    %31 = vector.broadcast %cst_19 : f32 to vector<256x128xf32>
    %32 = arith.maximumf %30, %31 : vector<256x128xf32>
    %33 = vector.shape_cast %32 : vector<256x128xf32> to vector<1x16x16x128xf32>
    %c0_20 = arith.constant 0 : index
    %c0_21 = arith.constant 0 : index
    %c0_22 = arith.constant 0 : index
    %c0_23 = arith.constant 0 : index
    %34 = vector.load %arg5[%c0_20, %c0_21, %c0_22, %c0_23] : memref<1x16x16x128xf32, #tpu.memory_space<vmem>>, vector<1x16x16x128xf32>
    tpu.vector_store %arg5[%c0_20, %c0_21, %c0_22, %c0_23], %33 {strides = array<i32>} : memref<1x16x16x128xf32, #tpu.memory_space<vmem>>, vector<1x16x16x128xf32>,
    return
  }
  func.func @transform_0(%arg0: i32, %arg1: i32) -> (i32, i32, i32, i32) {
    %c0_i32 = arith.constant 0 : i32
    %c0_i32_0 = arith.constant 0 : i32
    %c0_i32_1 = arith.constant 0 : i32
    %c0_i32_2 = arith.constant 0 : i32
    return %arg0, %c0_i32, %c0_i32_0, %c0_i32_1 : i32, i32, i32, i32
  }
  func.func @transform_1(%arg0: i32, %arg1: i32) -> (i32, i32, i32) {
    %c0_i32 = arith.constant 0 : i32
    %c0_i32_0 = arith.constant 0 : i32
    %c0_i32_1 = arith.constant 0 : i32
    %c0_i32_2 = arith.constant 0 : i32
    return %c0_i32, %c0_i32_0, %c0_i32_1 : i32, i32, i32
  }
  func.func @transform_2(%arg0: i32, %arg1: i32) -> (i32, i32) {
    %c0_i32 = arith.constant 0 : i32
    %c0_i32_0 = arith.constant 0 : i32
    %c0_i32_1 = arith.constant 0 : i32
    return %c0_i32, %c0_i32_0 : i32, i32
  }
  func.func @transform_3(%arg0: i32, %arg1: i32) -> (i32, i32, i32, i32) {
    %c0_i32 = arith.constant 0 : i32
    %c0_i32_0 = arith.constant 0 : i32
    %c0_i32_1 = arith.constant 0 : i32
    return %arg0, %arg1, %c0_i32, %c0_i32_0 : i32, i32, i32, i32
  }
}

</mosaic_0001>

<bundles_post_ra>
// kernel: tpu_custom_call.1
= control target key start
LH: loop header
LB: loop body
LE: loop exit
PB: predicated region body
PF: predicated region fallthrough
CT: control target
= control target key end

     0   :  { %8 = vsyncpa [#allocation3], 0  ;;  %s2100_s0 = inlined_call_operand.vmem [shape: bf16[2,18,16,12], index: 0, kind: input, shape index: {}]   ;;  %s2101_s1 = inlined_call_operand.vmem [shape: bf16[3,12,128], index: 1, kind: input, shape index: {}]   ;;  %s2102_s2 = inlined_call_operand.vmem [shape: f32[1,128], index: 2, kind: input, shape index: {}]   ;;  %s2103_s3 = inlined_call_operand.hbm [shape: f32[2,16,16,128], index: 3, kind: output, shape index: {}]  }
   0x1   :  { %10 = vsyncpa [#allocation3 + $0x1], 0  ;;  %s1760_s12 = smov 0   ;;  %s1762_s13 = smov 0  }
   0x2   :  { %s1764_s14 = smov 0   ;;  %s1766_s15 = smov 0  }
   0x3   :  { %s1768_s16 = smov 0   ;;  %s1770_s17 = smov 0  }
   0x4 LB: > { %s1212_s18 = sadd.s32 4294967295, %s1736_s17   ;;  %s1213_s19 = sadd.s32 4294967294, %s1736_s17   ;;  %s1736_s17 = sphi %s1770_s17, %s16_s17   ;;  %s1732_s16 = sphi %s1768_s16, %s2110_s16   ;;  %s1728_s15 = sphi %s1766_s15, %s2109_s15   ;;  %s1724_s14 = sphi %s1764_s14, %s2108_s14   ;;  %s1720_s13 = sphi %s1762_s13, %s2107_s13   ;;  %s1716_s12 = sphi %s1760_s12, %s2106_s12  }
   0x5   : > { %s28_s20 = sadd.s32 1, %s1732_s16  ;;  %s105_s21 = sadd.s32 1, %s1724_s14 }
   0x6   : > { %p30_p0 = scmp.ge.s32.totalorder %s28_s20, 2  ;;  %p115_p1 = scmp.ne.s32.totalorder %s1724_s14, %s1720_s13 }
   0x7   : > { %p116_p2 = scmp.eq.s32.totalorder %s1212_s18, 1  ;;  %p121_p3 = scmp.ne.s32.totalorder %s1720_s13, %s1716_s12 }
   0x8   : > { %s2112_s20 = smov (%p30_p0, %s28_s20), 0  ;;  %p122_p5 = scmp.eq.s32.totalorder %s1213_s19, 1 }
   0x9   : > { %p1800_p4 = por %p116_p2, %p115_p1  ;;  %s100_s23 = ssub.s32 %s1732_s16, %s2112_s20 }
   0xa   : > { %p1216_p6 = scmp.ge.s32.totalorder %s1736_s17, 1  ;;  %p103_p7 = scmp.eq.s32.totalorder %s100_s23, 0 }
   0xb   : > { %p1807_p8 = por %p122_p5, %p121_p3  ;;  %p154_p9 = scmp.lt.s32.totalorder %s1736_s17, 3 }
   0xc   : > { %s1813_s25 = scalar_select %p103_p7, %s1724_s14, %s105_s21  }
   0xd   : > { %p155_p10 = pnand %p1216_p6, %p154_p9 }
   0xe   : > { %p178_p11 = scmp.lt.s32.totalorder (!%p155_p10), %s1728_s15, 1  ;;  %s175_s26 = sand.u32 (!%p155_p10), 1, %s1720_s13  }
   0xf   : > { %158 = sbr.rel (%p155_p10) target bundleno = 355 (0x163), region = 32  ;;  %s1217_s29 = sshll.u32 (!%p155_p10), %s175_s26, 8 }
  0x10   : > { %s1926_s30 = scalar_lea.vmem (!%p155_p10), [#allocation2], %s1217_s29  ;;  %s1595_s4 = sshll.u32 (!%p155_p10), %s1728_s15, 8 }
  0x11   : > { %s1125_s7 = scalar_lea.hbm (!%p155_p10), %s2103_s3, %s1595_s4  ;;  %s1111_s9 = scalar_lea.sflag (!%p155_p10), [#allocation3], %s175_s26 }
  0x12   : > { %s1128_s8 = sshll.u32 (!%p155_p10), %s1125_s7, 4  ;;  %s1678_s21 = scalar_lea.hbm (!%p155_p10), %s2103_s3, 512  ;;  %s1129_s8 = int_to_ptr.hbm [resolvable:$true] %s1128_s8 }
  0x13   : > { %s1672_s10 = sshra.s32 (!%p155_p10), %s1129_s8, 4  ;;  %s1673_s10 = int_to_ptr.hbm [resolvable:$true] %s1672_s10 }
  0x14   : > { %v1319_v0 = vld [vmem:[%s2101_s1 + $0x8] sm:$0xf]  ;;  %v1577_v1 = vld [vmem:[%s2101_s1 + $0x8] sm:$0x30]  ;;  %vm396_vm0 = vcmask 1045504   ;;  %s179_s11 = scalar_select %p178_p11, %s1728_s15, 1 }
  0x15   : > { %v1320_v2 = vor.u32 %v1577_v1, %v1319_v0  ;;  %v1403_v3 = vld [vmem:[%s2101_s1] sm:$0xf]  ;;  %v1560_v4 = vld [vmem:[%s2101_s1] sm:$0x30]  ;;  %v1521_v5 = vld [vmem:[%s2101_s1 + $0x10] sm:$0xf]  ;;  %p1679_p1 = scmp.lt.s32.totalorder %s1673_s10, %s2103_s3 }
  0x16   : > { %v1404_v6 = vor.u32 %v1560_v4, %v1403_v3  ;;  %v1594_v7 = vld [vmem:[%s2101_s1 + $0x10] sm:$0x30]  ;;  %s1599_s18 = smul.u32 144, %s179_s11  ;;  %vm347_vm1 = vcmask 97280   ;;  %v1921_v52 = vld [vmem:[%s2102_s2] ss:$0 sm:$0xff] }
  0x17   : > { %v398_v8 = vsel %vm396_vm0, %v1320_v2, 0  ;;  %v1522_v9 = vor.u32 %v1594_v7, %v1521_v5  ;;  %s1126_s15 = sshll.u32 %s1926_s30, 4  ;;  %s1674_s11 = scalar_lea.hbm %s1673_s10, 256  ;;  %s1127_s15 = int_to_ptr.vmem [resolvable:$true] %s1126_s15 }
  0x18   : > { %407 = vmatpush.bf16.msra.mxu0 %v398_v8  ;;  %1596 = vmatpush.bf16.msra.mxu3 %v398_v8  ;;  %v623_v10 = vsel %vm396_vm0, %v1404_v6, 0  ;;  %s1841_s23 = scalar_lea.vmem %s2100_s0, %s1599_s18  ;;  %p1675_p12 = scmp.ne.s32.totalorder %s1673_s10, %s1674_s11 }
  0x19   : > { %632 = vmatpush.bf16.msra.mxu1 %v623_v10  ;;  %v887_v11 = vsel %vm396_vm0, %v1522_v9, 0  ;;  %v1561_v12 = vld [vmem:[%s1841_s23 + $0x8] sm:$0xff]  ;;  %v1544_v14 = vld [vmem:[%s1841_s23] sm:$0xff]  ;;  %v1578_v15 = vld [vmem:[%s1841_s23 + $0x10] sm:$0xff]  ;;  %p1680_p2 = scmp.lt.s32.totalorder %s1678_s21, %s1674_s11 }
  0x1a   : > { %896 = vmatpush.bf16.msra.mxu2 %v887_v11  ;;  %v1573_v13 = vld [vmem:[%s1841_s23 + $0x68] sm:$0xff]  ;;  %v1562_v16 = vld [vmem:[%s1841_s23 + $0x10] sm:$0xff]  ;;  %v1579_v19 = vld [vmem:[%s1841_s23 + $0x18] sm:$0xff]  ;;  %p1676_p13 = pnand %p1675_p12, %p1800_p4 }
  0x1b   : > { %1321 = vmatmul.msk.bf16.vlgmr.msra.gmra.mxu0 %vm347_vm1, %v1561_v12  ;;  %1333 = vmatmul.msk.bf16.vlgmr.msra.gmra.mxu3 %vm347_vm1, %v1573_v13  ;;  %v1574_v17 = vld [vmem:[%s1841_s23 + $0x70] sm:$0xff]  ;;  %v1545_v18 = vld [vmem:[%s1841_s23 + $0x8] sm:$0xff]  ;;  %v1563_v20 = vld [vmem:[%s1841_s23 + $0x18] sm:$0xff]  ;;  %p1681_p3 = por %p1680_p2, %p1679_p1 }
  0x1c   : > { %1597 = vmatpush.bf16.msrb.mxu3 %v623_v10  ;;  %1405 = vmatmul.msk.bf16.vlgmr.msra.gmra.mxu1 %vm347_vm1, %v1544_v14  ;;  %v1575_v21 = vld [vmem:[%s1841_s23 + $0x78] sm:$0xff]  ;;  %v1546_v22 = vld [vmem:[%s1841_s23 + $0x10] sm:$0xff]  ;;  %v1580_v23 = vld [vmem:[%s1841_s23 + $0x20] sm:$0xff]  ;;  %p1677_p0 = pneg %p1676_p13 }
  0x1d   : > { %1523 = vmatmul.msk.bf16.vlgmr.msra.gmra.mxu2 %vm347_vm1, %v1578_v15  ;;  %v1564_v24 = vld [vmem:[%s1841_s23 + $0x20] sm:$0xff]  ;;  %v1547_v26 = vld [vmem:[%s1841_s23 + $0x18] sm:$0xff]  ;;  %v1581_v27 = vld [vmem:[%s1841_s23 + $0x28] sm:$0xff] }
  0x1e   : > { %v1576_v25 = vld [vmem:[%s1841_s23 + $0x80] sm:$0xff]  ;;  %v1565_v28 = vld [vmem:[%s1841_s23 + $0x28] sm:$0xff]  ;;  %v1582_v31 = vld [vmem:[%s1841_s23 + $0x30] sm:$0xff]  ;;  %p1682_p5 = pnand %p1681_p3, %p1677_p0 }
  0x1f   : > { %v1556_v29 = vld [vmem:[%s1841_s23 + $0x60] sm:$0xff]  ;;  %v1566_v32 = vld [vmem:[%s1841_s23 + $0x30] sm:$0xff]  ;;  %v1557_v33 = vld [vmem:[%s1841_s23 + $0x68] sm:$0xff] }
  0x20   : > { %1598 = vmatpush.bf16.msra.mxu3 %v887_v11  ;;  %v1548_v30 = vld [vmem:[%s1841_s23 + $0x20] sm:$0xff]  ;;  %v1549_v34 = vld [vmem:[%s1841_s23 + $0x28] sm:$0xff]  ;;  %v1583_v35 = vld [vmem:[%s1841_s23 + $0x38] sm:$0xff] }
  0x21   : > { %v1567_v36 = vld [vmem:[%s1841_s23 + $0x38] sm:$0xff]  ;;  %v1558_v37 = vld [vmem:[%s1841_s23 + $0x70] sm:$0xff]  ;;  %v1584_v39 = vld [vmem:[%s1841_s23 + $0x40] sm:$0xff] }
  0x22   : > { %v1550_v38 = vld [vmem:[%s1841_s23 + $0x30] sm:$0xff]  ;;  %v1568_v40 = vld [vmem:[%s1841_s23 + $0x40] sm:$0xff]  ;;  %v1559_v41 = vld [vmem:[%s1841_s23 + $0x78] sm:$0xff] }
  0x23   : > { %v1551_v42 = vld [vmem:[%s1841_s23 + $0x38] sm:$0xff]  ;;  %v1585_v43 = vld [vmem:[%s1841_s23 + $0x48] sm:$0xff]  ;;  %v1590_v45 = vld [vmem:[%s1841_s23 + $0x70] sm:$0xff] }
  0x24   : > { %v1569_v44 = vld [vmem:[%s1841_s23 + $0x48] sm:$0xff]  ;;  %v1552_v47 = vld [vmem:[%s1841_s23 + $0x40] sm:$0xff]  ;;  %v1586_v48 = vld [vmem:[%s1841_s23 + $0x50] sm:$0xff] }
  0x25   : > { %v1570_v62 = vld [vmem:[%s1841_s23 + $0x50] sm:$0xff]  ;;  %v1591_v63 = vld [vmem:[%s1841_s23 + $0x78] sm:$0xff]  ;;  %v1553_v2 = vld [vmem:[%s1841_s23 + $0x48] sm:$0xff] }
  0x26   : > { %v1587_v3 = vld [vmem:[%s1841_s23 + $0x58] sm:$0xff] }
  0x2b   : > { %1322 = vmatmul.msk.bf16.gmra.mxu0 %vm347_vm1, %v1562_v16  ;;  %1334 = vmatmul.msk.bf16.gmra.mxu3 %vm347_vm1, %v1574_v17 }
  0x2c   : > { %1406 = vmatmul.msk.bf16.gmra.mxu1 %vm347_vm1, %v1545_v18  ;;  %v1571_v18 = vld [vmem:[%s1841_s23 + $0x58] sm:$0xff] }
  0x2d   : > { %1524 = vmatmul.msk.bf16.gmra.mxu2 %vm347_vm1, %v1579_v19  ;;  %v1592_v19 = vld [vmem:[%s1841_s23 + $0x80] sm:$0xff] }
  0x3b   : > { %1323 = vmatmul.msk.bf16.gmra.mxu0 %vm347_vm1, %v1563_v20  ;;  %1335 = vmatmul.msk.bf16.gmra.mxu3 %vm347_vm1, %v1575_v21 }
  0x3c   : > { %1407 = vmatmul.msk.bf16.gmra.mxu1 %vm347_vm1, %v1546_v22  ;;  %v1554_v22 = vld [vmem:[%s1841_s23 + $0x50] sm:$0xff] }
  0x3d   : > { %1525 = vmatmul.msk.bf16.gmra.mxu2 %vm347_vm1, %v1580_v23  ;;  %v1588_v23 = vld [vmem:[%s1841_s23 + $0x60] sm:$0xff] }
  0x4b   : > { %1324 = vmatmul.msk.bf16.gmra.mxu0 %vm347_vm1, %v1564_v24  ;;  %1336 = vmatmul.msk.bf16.gmra.mxu3 %vm347_vm1, %v1576_v25 }
  0x4c   : > { %1408 = vmatmul.msk.bf16.gmra.mxu1 %vm347_vm1, %v1547_v26 }
  0x4d   : > { %1526 = vmatmul.msk.bf16.gmra.mxu2 %vm347_vm1, %v1581_v27 }
  0x5b   : > { %1325 = vmatmul.msk.bf16.gmra.mxu0 %vm347_vm1, %v1565_v28  ;;  %1417 = vmatmul.msk.bf16.vlgmr.msrb.gmra.mxu3 %vm347_vm1, %v1556_v29 }
  0x5c   : > { %1409 = vmatmul.msk.bf16.gmra.mxu1 %vm347_vm1, %v1548_v30 }
  0x5d   : > { %1527 = vmatmul.msk.bf16.gmra.mxu2 %vm347_vm1, %v1582_v31 }
  0x6b   : > { %1326 = vmatmul.msk.bf16.gmra.mxu0 %vm347_vm1, %v1566_v32  ;;  %1418 = vmatmul.msk.bf16.gmra.mxu3 %vm347_vm1, %v1557_v33 }
  0x6c   : > { %1410 = vmatmul.msk.bf16.gmra.mxu1 %vm347_vm1, %v1549_v34 }
  0x6d   : > { %1528 = vmatmul.msk.bf16.gmra.mxu2 %vm347_vm1, %v1583_v35 }
  0x7b   : > { %1327 = vmatmul.msk.bf16.gmra.mxu0 %vm347_vm1, %v1567_v36  ;;  %1419 = vmatmul.msk.bf16.gmra.mxu3 %vm347_vm1, %v1558_v37 }
  0x7c   : > { %1411 = vmatmul.msk.bf16.gmra.mxu1 %vm347_vm1, %v1550_v38  ;;  %v1572_v38 = vld [vmem:[%s1841_s23 + $0x60] sm:$0xff] }
  0x7d   : > { %1529 = vmatmul.msk.bf16.gmra.mxu2 %vm347_vm1, %v1584_v39  ;;  %v1593_v39 = vld [vmem:[%s1841_s23 + $0x88] sm:$0xff] }
  0x8b   : > { %1328 = vmatmul.msk.bf16.gmra.mxu0 %vm347_vm1, %v1568_v40  ;;  %1420 = vmatmul.msk.bf16.gmra.mxu3 %vm347_vm1, %v1559_v41 }
  0x8c   : > { %1412 = vmatmul.msk.bf16.gmra.mxu1 %vm347_vm1, %v1551_v42  ;;  %v1555_v42 = vld [vmem:[%s1841_s23 + $0x58] sm:$0xff] }
  0x8d   : > { %1530 = vmatmul.msk.bf16.gmra.mxu2 %vm347_vm1, %v1585_v43  ;;  %v1589_v43 = vld [vmem:[%s1841_s23 + $0x68] sm:$0xff] }
  0x98   : > { %v409_v46 = vpop.f32.mrf.mxu0 }
  0x99   : > { %v634_v49 = vpop.f32.mrf.mxu1 }
  0x9a   : > { %v635_v50 = vadd.f32 %v634_v49, %v409_v46 }
  0x9b   : > { %1329 = vmatmul.msk.bf16.gmra.mxu0 %vm347_vm1, %v1569_v44  ;;  %1535 = vmatmul.msk.bf16.vlgmr.msra.gmra.mxu3 %vm347_vm1, %v1590_v45 }
  0x9c   : > { %1413 = vmatmul.msk.bf16.gmra.mxu1 %vm347_vm1, %v1552_v47 }
  0x9d   : > { %1531 = vmatmul.msk.bf16.gmra.mxu2 %vm347_vm1, %v1586_v48 }
  0x9e   : > { %v1916_v51 = vpop.f32.mrf.mxu3 }
  0xa0   : > { %v898_v53 = vpop.f32.mrf.mxu2  ;;  %v411_v55 = vpop.f32.mrf.mxu0 }
  0xa1   : > { %v978_v54 = vadd.f32 %v898_v53, %v635_v50  ;;  %v636_v56 = vpop.f32.mrf.mxu1 }
  0xa2   : > { %v637_v59 = vadd.f32 %v636_v56, %v411_v55 }
  0xa3   : > { %v1014_v57 = vadd.f32 %v1921_v52, %v978_v54 }
  0xa5   : > { %v1046_v58 = vmax.f32 %v1014_v57, 0.0 }
  0xa6   : > { %v1929_v60 = vpop.f32.mrf.mxu3 }
  0xa7   : > { %1078 = vst [vmem:[%s1926_s30] sm:$0xff] %v1046_v58 }
  0xa8   : > { %v900_v61 = vpop.f32.mrf.mxu2  ;;  %v414_v1 = vpop.f32.mrf.mxu0 }
  0xa9   : > { %v979_v0 = vadd.f32 %v900_v61, %v637_v59  ;;  %v639_v4 = vpop.f32.mrf.mxu1 }
  0xaa   : > { %v640_v7 = vadd.f32 %v639_v4, %v414_v1 }
  0xab   : > { %v1015_v5 = vadd.f32 %v1921_v52, %v979_v0  ;;  %1330 = vmatmul.msk.bf16.gmra.mxu0 %vm347_vm1, %v1570_v62  ;;  %1536 = vmatmul.msk.bf16.gmra.mxu3 %vm347_vm1, %v1591_v63 }
  0xac   : > { %1414 = vmatmul.msk.bf16.gmra.mxu1 %vm347_vm1, %v1553_v2 }
  0xad   : > { %v1047_v6 = vmax.f32 %v1015_v5, 0.0  ;;  %1532 = vmatmul.msk.bf16.gmra.mxu2 %vm347_vm1, %v1587_v3 }
  0xae   : > { %v1941_v8 = vpop.f32.mrf.mxu3 }
  0xaf   : > { %1079 = vst [vmem:[%s1926_s30 + $0x8] sm:$0xff] %v1047_v6 }
  0xb0   : > { %v903_v9 = vpop.f32.mrf.mxu2  ;;  %v416_v11 = vpop.f32.mrf.mxu0 }
  0xb1   : > { %v980_v10 = vadd.f32 %v903_v9, %v640_v7  ;;  %v641_v12 = vpop.f32.mrf.mxu1 }
  0xb2   : > { %v642_v15 = vadd.f32 %v641_v12, %v416_v11 }
  0xb3   : > { %v1016_v13 = vadd.f32 %v1921_v52, %v980_v10 }
  0xb5   : > { %v1048_v14 = vmax.f32 %v1016_v13, 0.0 }
  0xb6   : > { %v1945_v16 = vpop.f32.mrf.mxu3 }
  0xb7   : > { %1080 = vst [vmem:[%s1926_s30 + $0x10] sm:$0xff] %v1048_v14 }
  0xb8   : > { %v905_v17 = vpop.f32.mrf.mxu2  ;;  %v419_v21 = vpop.f32.mrf.mxu0 }
  0xb9   : > { %v981_v20 = vadd.f32 %v905_v17, %v642_v15  ;;  %v644_v24 = vpop.f32.mrf.mxu1 }
  0xba   : > { %v645_v27 = vadd.f32 %v644_v24, %v419_v21 }
  0xbb   : > { %v1017_v25 = vadd.f32 %v1921_v52, %v981_v20  ;;  %1331 = vmatmul.msk.bf16.gmra.mxu0 %vm347_vm1, %v1571_v18  ;;  %1537 = vmatmul.msk.bf16.gmra.mxu3 %vm347_vm1, %v1592_v19 }
  0xbc   : > { %1415 = vmatmul.msk.bf16.gmra.mxu1 %vm347_vm1, %v1554_v22 }
  0xbd   : > { %v1049_v26 = vmax.f32 %v1017_v25, 0.0  ;;  %1533 = vmatmul.msk.bf16.gmra.mxu2 %vm347_vm1, %v1588_v23 }
  0xbe   : > { %v1957_v28 = vpop.f32.mrf.mxu3 }
  0xbf   : > { %1081 = vst [vmem:[%s1926_s30 + $0x18] sm:$0xff] %v1049_v26 }
  0xc0   : > { %v908_v29 = vpop.f32.mrf.mxu2  ;;  %v421_v31 = vpop.f32.mrf.mxu0 }
  0xc1   : > { %v982_v30 = vadd.f32 %v908_v29, %v645_v27  ;;  %v646_v32 = vpop.f32.mrf.mxu1 }
  0xc2   : > { %v647_v35 = vadd.f32 %v646_v32, %v421_v31 }
  0xc3   : > { %v1018_v33 = vadd.f32 %v1921_v52, %v982_v30 }
  0xc5   : > { %v1050_v34 = vmax.f32 %v1018_v33, 0.0 }
  0xc6   : > { %v1961_v36 = vpop.f32.mrf.mxu3 }
  0xc7   : > { %1082 = vst [vmem:[%s1926_s30 + $0x20] sm:$0xff] %v1050_v34 }
  0xc8   : > { %v910_v37 = vpop.f32.mrf.mxu2  ;;  %v424_v41 = vpop.f32.mrf.mxu0 }
  0xc9   : > { %v983_v40 = vadd.f32 %v910_v37, %v647_v35  ;;  %v649_v44 = vpop.f32.mrf.mxu1 }
  0xca   : > { %v650_v47 = vadd.f32 %v649_v44, %v424_v41 }
  0xcb   : > { %v1019_v45 = vadd.f32 %v1921_v52, %v983_v40  ;;  %1332 = vmatmul.msk.bf16.gmra.mxu0 %vm347_vm1, %v1572_v38  ;;  %1538 = vmatmul.msk.bf16.gmra.mxu3 %vm347_vm1, %v1593_v39 }
  0xcc   : > { %1416 = vmatmul.msk.bf16.gmra.mxu1 %vm347_vm1, %v1555_v42 }
  0xcd   : > { %v1051_v46 = vmax.f32 %v1019_v45, 0.0  ;;  %1534 = vmatmul.msk.bf16.gmra.mxu2 %vm347_vm1, %v1589_v43 }
  0xce   : > { %v1973_v48 = vpop.f32.mrf.mxu3 }
  0xcf   : > { %1083 = vst [vmem:[%s1926_s30 + $0x28] sm:$0xff] %v1051_v46 }
  0xd0   : > { %v913_v49 = vpop.f32.mrf.mxu2  ;;  %v426_v53 = vpop.f32.mrf.mxu0 }
  0xd1   : > { %v984_v50 = vadd.f32 %v913_v49, %v650_v47  ;;  %v651_v54 = vpop.f32.mrf.mxu1 }
  0xd2   : > { %v652_v57 = vadd.f32 %v651_v54, %v426_v53 }
  0xd3   : > { %v1020_v55 = vadd.f32 %v1921_v52, %v984_v50 }
  0xd5   : > { %v1052_v56 = vmax.f32 %v1020_v55, 0.0 }
  0xd6   : > { %v1977_v58 = vpop.f32.mrf.mxu3 }
  0xd7   : > { %1084 = vst [vmem:[%s1926_s30 + $0x30] sm:$0xff] %v1052_v56 }
  0xd8   : > { %v915_v59 = vpop.f32.mrf.mxu2  ;;  %v429_v62 = vpop.f32.mrf.mxu0 }
  0xd9   : > { %v985_v61 = vadd.f32 %v915_v59, %v652_v57  ;;  %v654_v63 = vpop.f32.mrf.mxu1 }
  0xda   : > { %v655_v2 = vadd.f32 %v654_v63, %v429_v62 }
  0xdb   : > { %v1021_v0 = vadd.f32 %v1921_v52, %v985_v61 }
  0xdd   : > { %v1053_v1 = vmax.f32 %v1021_v0, 0.0 }
  0xde   : > { %v1981_v3 = vpop.f32.mrf.mxu3 }
  0xdf   : > { %1085 = vst [vmem:[%s1926_s30 + $0x38] sm:$0xff] %v1053_v1 }
  0xe0   : > { %v918_v4 = vpop.f32.mrf.mxu2  ;;  %v431_v6 = vpop.f32.mrf.mxu0 }
  0xe1   : > { %v986_v5 = vadd.f32 %v918_v4, %v655_v2  ;;  %v656_v7 = vpop.f32.mrf.mxu1 }
  0xe2   : > { %v657_v11 = vadd.f32 %v656_v7, %v431_v6 }
  0xe3   : > { %v1022_v9 = vadd.f32 %v1921_v52, %v986_v5 }
  0xe5   : > { %v1054_v10 = vmax.f32 %v1022_v9, 0.0 }
  0xe6   : > { %v1985_v12 = vpop.f32.mrf.mxu3 }
  0xe7   : > { %1086 = vst [vmem:[%s1926_s30 + $0x40] sm:$0xff] %v1054_v10 }
  0xe8   : > { %v920_v13 = vpop.f32.mrf.mxu2  ;;  %v434_v15 = vpop.f32.mrf.mxu0 }
  0xe9   : > { %v987_v14 = vadd.f32 %v920_v13, %v657_v11  ;;  %v659_v17 = vpop.f32.mrf.mxu1 }
  0xea   : > { %v660_v20 = vadd.f32 %v659_v17, %v434_v15  ;;  %v695_v15 = vadd.f32 %v1981_v3, %v1916_v51 }
  0xeb   : > { %v1023_v18 = vadd.f32 %v1921_v52, %v987_v14 }
  0xed   : > { %v1055_v19 = vmax.f32 %v1023_v18, 0.0 }
  0xee   : > { %v1989_v21 = vpop.f32.mrf.mxu3 }
  0xef   : > { %1087 = vst [vmem:[%s1926_s30 + $0x48] sm:$0xff] %v1055_v19 }
  0xf0   : > { %v923_v22 = vpop.f32.mrf.mxu2  ;;  %v436_v24 = vpop.f32.mrf.mxu0 }
  0xf1   : > { %v988_v23 = vadd.f32 %v923_v22, %v660_v20  ;;  %v661_v25 = vpop.f32.mrf.mxu1 }
  0xf2   : > { %v662_v29 = vadd.f32 %v661_v25, %v436_v24 }
  0xf3   : > { %v1024_v26 = vadd.f32 %v1921_v52, %v988_v23 }
  0xf5   : > { %v1056_v27 = vmax.f32 %v1024_v26, 0.0 }
  0xf6   : > { %v1993_v30 = vpop.f32.mrf.mxu3 }
  0xf7   : > { %1088 = vst [vmem:[%s1926_s30 + $0x50] sm:$0xff] %v1056_v27 }
  0xf8   : > { %v925_v31 = vpop.f32.mrf.mxu2  ;;  %v439_v33 = vpop.f32.mrf.mxu0 }
  0xf9   : > { %v989_v32 = vadd.f32 %v925_v31, %v662_v29  ;;  %v664_v34 = vpop.f32.mrf.mxu1  ;;  %v697_v29 = vadd.f32 %v1985_v12, %v1929_v60  ;;  %v700_v60 = vadd.f32 %v1989_v21, %v1941_v8 }
  0xfa   : > { %v665_v38 = vadd.f32 %v664_v34, %v439_v33 }
  0xfb   : > { %v1025_v35 = vadd.f32 %v1921_v52, %v989_v32 }
  0xfd   : > { %v1057_v37 = vmax.f32 %v1025_v35, 0.0 }
  0xfe   : > { %v1997_v39 = vpop.f32.mrf.mxu3 }
  0xff   : > { %1089 = vst [vmem:[%s1926_s30 + $0x58] sm:$0xff] %v1057_v37 }
 0x100   : > { %v928_v40 = vpop.f32.mrf.mxu2  ;;  %v441_v42 = vpop.f32.mrf.mxu0 }
 0x101   : > { %v990_v41 = vadd.f32 %v928_v40, %v665_v38  ;;  %v666_v43 = vpop.f32.mrf.mxu1 }
 0x102   : > { %v667_v46 = vadd.f32 %v666_v43, %v441_v42 }
 0x103   : > { %v1026_v44 = vadd.f32 %v1921_v52, %v990_v41 }
 0x105   : > { %v1058_v45 = vmax.f32 %v1026_v44, 0.0 }
 0x106   : > { %v2001_v47 = vpop.f32.mrf.mxu3 }
 0x107   : > { %1090 = vst [vmem:[%s1926_s30 + $0x60] sm:$0xff] %v1058_v45 }
 0x108   : > { %v930_v49 = vpop.f32.mrf.mxu2  ;;  %v444_v53 = vpop.f32.mrf.mxu0 }
 0x109   : > { %v991_v50 = vadd.f32 %v930_v49, %v667_v46  ;;  %v669_v54 = vpop.f32.mrf.mxu1 }
 0x10a   : > { %v670_v57 = vadd.f32 %v669_v54, %v444_v53 }
 0x10b   : > { %v1027_v55 = vadd.f32 %v1921_v52, %v991_v50 }
 0x10d   : > { %v1059_v56 = vmax.f32 %v1027_v55, 0.0 }
 0x10e   : > { %v2005_v59 = vpop.f32.mrf.mxu3 }
 0x10f   : > { %1091 = vst [vmem:[%s1926_s30 + $0x68] sm:$0xff] %v1059_v56  ;;  %v702_v56 = vadd.f32 %v1993_v30, %v1945_v16  ;;  %v705_v16 = vadd.f32 %v1997_v39, %v1957_v28 }
 0x110   : > { %v933_v61 = vpop.f32.mrf.mxu2  ;;  %v446_v63 = vpop.f32.mrf.mxu0 }
 0x111   : > { %v992_v62 = vadd.f32 %v933_v61, %v670_v57  ;;  %v671_v0 = vpop.f32.mrf.mxu1 }
 0x112   : > { %v672_v4 = vadd.f32 %v671_v0, %v446_v63 }
 0x113   : > { %v1028_v1 = vadd.f32 %v1921_v52, %v992_v62 }
 0x115   : > { %v1060_v2 = vmax.f32 %v1028_v1, 0.0 }
 0x116   : > { %v2009_v5 = vpop.f32.mrf.mxu3 }
 0x117   : > { %1092 = vst [vmem:[%s1926_s30 + $0x70] sm:$0xff] %v1060_v2 }
 0x118   : > { %v935_v6 = vpop.f32.mrf.mxu2  ;;  %v449_v9 = vpop.f32.mrf.mxu0 }
 0x119   : > { %v993_v7 = vadd.f32 %v935_v6, %v672_v4  ;;  %v674_v10 = vpop.f32.mrf.mxu1 }
 0x11a   : > { %v675_v14 = vadd.f32 %v674_v10, %v449_v9 }
 0x11b   : > { %v1029_v11 = vadd.f32 %v1921_v52, %v993_v7 }
 0x11d   : > { %v1061_v13 = vmax.f32 %v1029_v11, 0.0 }
 0x11e   : > { %v958_v17 = vpop.f32.mrf.mxu3 }
 0x11f   : > { %1093 = vst [vmem:[%s1926_s30 + $0x78] sm:$0xff] %v1061_v13  ;;  %v1002_v19 = vadd.f32 %v958_v17, %v695_v15 }
 0x120   : > { %v938_v18 = vpop.f32.mrf.mxu2  ;;  %v451_v22 = vpop.f32.mrf.mxu0 }
 0x121   : > { %v994_v20 = vadd.f32 %v938_v18, %v675_v14  ;;  %v1038_v23 = vadd.f32 %v1921_v52, %v1002_v19  ;;  %v676_v24 = vpop.f32.mrf.mxu1 }
 0x122   : > { %v677_v51 = vadd.f32 %v676_v24, %v451_v22 }
 0x123   : > { %v1030_v25 = vadd.f32 %v1921_v52, %v994_v20  ;;  %v1070_v26 = vmax.f32 %v1038_v23, 0.0  ;;  %v707_v20 = vadd.f32 %v2001_v47, %v1961_v36  ;;  %v710_v36 = vadd.f32 %v2005_v59, %v1973_v48 }
 0x124   : > { %v712_v48 = vadd.f32 %v2009_v5, %v1977_v58 }
 0x125   : > { %v1062_v27 = vmax.f32 %v1030_v25, 0.0  ;;  %1102 = vst [vmem:[%s1926_s30 + $0xc0] sm:$0xff] %v1070_v26 }
 0x126   : > { %v960_v3 = vpop.f32.mrf.mxu3 }
 0x127   : > { %1094 = vst [vmem:[%s1926_s30 + $0x80] sm:$0xff] %v1062_v27  ;;  %v1003_v32 = vadd.f32 %v960_v3, %v697_v29 }
 0x128   : > { %v940_v31 = vpop.f32.mrf.mxu2  ;;  %v454_v34 = vpop.f32.mrf.mxu0 }
 0x129   : > { %v995_v33 = vadd.f32 %v940_v31, %v677_v51  ;;  %v1039_v35 = vadd.f32 %v1921_v52, %v1003_v32  ;;  %v679_v37 = vpop.f32.mrf.mxu1 }
 0x12a   : > { %v680_v42 = vadd.f32 %v679_v37, %v454_v34 }
 0x12b   : > { %v1031_v38 = vadd.f32 %v1921_v52, %v995_v33  ;;  %v1071_v40 = vmax.f32 %v1039_v35, 0.0 }
 0x12d   : > { %v1063_v41 = vmax.f32 %v1031_v38, 0.0  ;;  %1103 = vst [vmem:[%s1926_s30 + $0xc8] sm:$0xff] %v1071_v40 }
 0x12e   : > { %v963_v12 = vpop.f32.mrf.mxu3 }
 0x12f   : > { %1095 = vst [vmem:[%s1926_s30 + $0x88] sm:$0xff] %v1063_v41  ;;  %v1004_v44 = vadd.f32 %v963_v12, %v700_v60 }
 0x130   : > { %v943_v43 = vpop.f32.mrf.mxu2  ;;  %v456_v46 = vpop.f32.mrf.mxu0 }
 0x131   : > { %v996_v45 = vadd.f32 %v943_v43, %v680_v42  ;;  %v1040_v49 = vadd.f32 %v1921_v52, %v1004_v44  ;;  %v681_v50 = vpop.f32.mrf.mxu1 }
 0x132   : > { %v682_v8 = vadd.f32 %v681_v50, %v456_v46 }
 0x133   : > { %v1032_v53 = vadd.f32 %v1921_v52, %v996_v45  ;;  %v1072_v54 = vmax.f32 %v1040_v49, 0.0 }
 0x135   : > { %v1064_v55 = vmax.f32 %v1032_v53, 0.0  ;;  %1104 = vst [vmem:[%s1926_s30 + $0xd0] sm:$0xff] %v1072_v54 }
 0x136   : > { %v965_v21 = vpop.f32.mrf.mxu3 }
 0x137   : > { %1096 = vst [vmem:[%s1926_s30 + $0x90] sm:$0xff] %v1064_v55  ;;  %v1005_v61 = vadd.f32 %v965_v21, %v702_v56 }
 0x138   : > { %v945_v57 = vpop.f32.mrf.mxu2  ;;  %v459_v63 = vpop.f32.mrf.mxu0 }
 0x139   : > { %v997_v62 = vadd.f32 %v945_v57, %v682_v8  ;;  %v1041_v0 = vadd.f32 %v1921_v52, %v1005_v61  ;;  %v684_v1 = vpop.f32.mrf.mxu1 }
 0x13a   : > { %v685_v7 = vadd.f32 %v684_v1, %v459_v63 }
 0x13b   : > { %v1033_v2 = vadd.f32 %v1921_v52, %v997_v62  ;;  %v1073_v4 = vmax.f32 %v1041_v0, 0.0 }
 0x13d   : > { %v1065_v6 = vmax.f32 %v1033_v2, 0.0  ;;  %1105 = vst [vmem:[%s1926_s30 + $0xd8] sm:$0xff] %v1073_v4 }
 0x13e   : > { %v968_v30 = vpop.f32.mrf.mxu3 }
 0x13f   : > { %1097 = vst [vmem:[%s1926_s30 + $0x98] sm:$0xff] %v1065_v6  ;;  %v1006_v10 = vadd.f32 %v968_v30, %v705_v16 }
 0x140   : > { %v948_v9 = vpop.f32.mrf.mxu2  ;;  %v461_v13 = vpop.f32.mrf.mxu0 }
 0x141   : > { %v998_v11 = vadd.f32 %v948_v9, %v685_v7  ;;  %v1042_v14 = vadd.f32 %v1921_v52, %v1006_v10  ;;  %v686_v15 = vpop.f32.mrf.mxu1 }
 0x142   : > { %v687_v28 = vadd.f32 %v686_v15, %v461_v13 }
 0x143   : > { %v1034_v17 = vadd.f32 %v1921_v52, %v998_v11  ;;  %v1074_v18 = vmax.f32 %v1042_v14, 0.0 }
 0x145   : > { %v1066_v19 = vmax.f32 %v1034_v17, 0.0  ;;  %1106 = vst [vmem:[%s1926_s30 + $0xe0] sm:$0xff] %v1074_v18 }
 0x146   : > { %v970_v39 = vpop.f32.mrf.mxu3 }
 0x147   : > { %1098 = vst [vmem:[%s1926_s30 + $0xa0] sm:$0xff] %v1066_v19  ;;  %v1007_v23 = vadd.f32 %v970_v39, %v707_v20 }
 0x148   : > { %v950_v22 = vpop.f32.mrf.mxu2  ;;  %v464_v26 = vpop.f32.mrf.mxu0 }
 0x149   : > { %v999_v24 = vadd.f32 %v950_v22, %v687_v28  ;;  %v1043_v25 = vadd.f32 %v1921_v52, %v1007_v23  ;;  %v689_v27 = vpop.f32.mrf.mxu1 }
 0x14a   : > { %v690_v31 = vadd.f32 %v689_v27, %v464_v26 }
 0x14b   : > { %v1035_v29 = vadd.f32 %v1921_v52, %v999_v24  ;;  %v1075_v51 = vmax.f32 %v1043_v25, 0.0 }
 0x14d   : > { %v1067_v3 = vmax.f32 %v1035_v29, 0.0  ;;  %1107 = vst [vmem:[%s1926_s30 + $0xe8] sm:$0xff] %v1075_v51 }
 0x14e   : > { %v973_v47 = vpop.f32.mrf.mxu3 }
 0x14f   : > { %1099 = vst [vmem:[%s1926_s30 + $0xa8] sm:$0xff] %v1067_v3  ;;  %v1008_v33 = vadd.f32 %v973_v47, %v710_v36 }
 0x150   : > { %v953_v32 = vpop.f32.mrf.mxu2  ;;  %v466_v40 = vpop.f32.mrf.mxu0 }
 0x151   : > { %v1000_v34 = vadd.f32 %v953_v32, %v690_v31  ;;  %v1044_v35 = vadd.f32 %v1921_v52, %v1008_v33  ;;  %v691_v41 = vpop.f32.mrf.mxu1 }
 0x152   : > { %v692_v59 = vadd.f32 %v691_v41, %v466_v40 }
 0x153   : > { %v1036_v37 = vadd.f32 %v1921_v52, %v1000_v34  ;;  %v1076_v38 = vmax.f32 %v1044_v35, 0.0 }
 0x155   : > { %v1068_v42 = vmax.f32 %v1036_v37, 0.0  ;;  %1108 = vst [vmem:[%s1926_s30 + $0xf0] sm:$0xff] %v1076_v38 }
 0x156   : > { %v975_v60 = vpop.f32.mrf.mxu3 }
 0x157   : > { %1100 = vst [vmem:[%s1926_s30 + $0xb0] sm:$0xff] %v1068_v42  ;;  %v1009_v43 = vadd.f32 %v975_v60, %v712_v48 }
 0x158   : > { %v955_v12 = vpop.f32.mrf.mxu2 }
 0x159   : > { %v1001_v44 = vadd.f32 %v955_v12, %v692_v59  ;;  %v1045_v45 = vadd.f32 %v1921_v52, %v1009_v43 }
 0x15b   : > { %v1037_v58 = vadd.f32 %v1921_v52, %v1001_v44  ;;  %v1077_v5 = vmax.f32 %v1045_v45, 0.0 }
 0x15d   : > { %v1069_v46 = vmax.f32 %v1037_v58, 0.0  ;;  %1109 = vst [vmem:[%s1926_s30 + $0xf8] sm:$0xff] %v1077_v5 }
 0x15f   : > { %1101 = vst [vmem:[%s1926_s30 + $0xb8] sm:$0xff] %v1069_v46 }
 0x160   : > { %1685 = shalt.err (!%p1682_p5)
}
 0x161   : > { %s1738_s26 = smov 128   ;;  %s1739_s28 = smov 8  }
 0x162   : > { %1600 = dma.vmem_to_hbm [thread:$0]  (%p1800_p4), %s1127_s15, 4096, %s1129_s8, %s1111_s9, %s1738_s26, %s1738_s26, %s1739_s28  }
 0x163 PF: > { %p1606_p6 = scmp.ge.s32.totalorder %s1736_s17, 2  ;;  %s1143_s29 = sand.u32 1, %s1716_s12  }
 0x164   : > { %s1144_s30 = scalar_lea.sflag [#allocation3], %s1143_s29 }
 0x165   : > { %p1603_p7 = pnand %p1606_p6, %p1807_p8 }
 0x167   : > { %p1604_p9 = pneg %p1603_p7 }
 0x169   : > { %1711 = dma.done.wait (%p1604_p9), %s1144_s30, 4096  }
 0x16a   : > { %1713 = vsyncadd (%p1604_p9), %s1144_s30, 4294963200  ;;  %s16_s17 = sadd.s32 1, %s1736_s17   ;;  %s2106_s12 = smov %s1720_s13 }
 0x16b   : > { %p13_p10 = scmp.ge.s32.totalorder %s16_s17, 4   ;;  %s2107_s13 = smov %s1724_s14 }
 0x16c   : > { %s2108_s14 = smov %s1813_s25  ;;  %s2109_s15 = smov %s1732_s16 }
 0x16d   : > { %s2110_s16 = smov %s2112_s20  ;;  %15 = sbr.rel (!%p13_p10) target bundleno = 4 (0x4), region = 72 }
 0x172   :  { %1150 = vsyncpa [#allocation3], 1 }
 0x173   :  { %1152 = vsyncpa [#allocation3 + $0x1], 1 }

</bundles_post_ra>
